<compile_context>
chip_gen: v6e
topology: v6e:2x2x1
jax: 0.10.0
libtpu: 0.0.40
codegen_flags: <defaults>
</compile_context>

<pallas_src>
import jax
import jax.numpy as jnp
import numpy as np
from jax import lax
from jax.experimental import pallas as pl
from jax.experimental.pallas import tpu as pltpu


def _make_kernel(K, dilation, pad, TL, has_downsample):
    def kernel(*refs):
        if has_downsample:
            (x_ref, w1_ref, t1_ref, w2_ref, t2_ref, wd_ref, bd_ref,
             out_ref, xbuf_ref, hbuf_ref) = refs
        else:
            (x_ref, w1_ref, t1_ref, w2_ref, t2_ref,
             out_ref, xbuf_ref, hbuf_ref) = refs

        t = pl.program_id(1)

        @pl.when(t == 0)
        def _():
            # causal left padding for the first L tile of each batch element
            xbuf_ref[:, :pad] = jnp.zeros((xbuf_ref.shape[0], pad), jnp.bfloat16)
            hbuf_ref[:, :pad] = jnp.zeros((hbuf_ref.shape[0], pad), jnp.bfloat16)

        x_bf = x_ref[...]                              # (C_in, TL) bf16
        # persistent (C, pad+TL) scratch: tile lives at columns [pad:]
        xbuf_ref[:, pad:] = x_bf

        # ---- conv layer 1 (BN folded): sum of K small dots, f32 accumulation ----
        acc1 = jnp.dot(w1_ref[0], xbuf_ref[:, 0:TL],
                       preferred_element_type=jnp.float32)
        for k in range(1, K):
            acc1 = acc1 + jnp.dot(
                w1_ref[k], xbuf_ref[:, k * dilation:k * dilation + TL],
                preferred_element_type=jnp.float32)
        h1 = jnp.maximum(acc1 + t1_ref[...], 0.0)
        hbuf_ref[:, pad:] = h1.astype(jnp.bfloat16)

        # ---- conv layer 2 ----
        acc2 = jnp.dot(w2_ref[0], hbuf_ref[:, 0:TL],
                       preferred_element_type=jnp.float32)
        for k in range(1, K):
            acc2 = acc2 + jnp.dot(
                w2_ref[k], hbuf_ref[:, k * dilation:k * dilation + TL],
                preferred_element_type=jnp.float32)
        h2 = jnp.maximum(acc2 + t2_ref[...], 0.0)

        # ---- residual (1x1 conv, or identity when C_in == C_out) ----
        if has_downsample:
            res = jnp.dot(wd_ref[...], x_bf,
                          preferred_element_type=jnp.float32) + bd_ref[...]
        else:
            res = x_bf.astype(jnp.float32)

        out_ref[...] = jnp.maximum(h2 + res, 0.0).astype(out_ref.dtype)

        # carry the last `pad` columns into the next L tile
        # (slice of the (old-carry || new-tile) buffer -> correct even if pad > TL)
        xbuf_ref[:, :pad] = xbuf_ref[:, TL:TL + pad]
        hbuf_ref[:, :pad] = hbuf_ref[:, TL:TL + pad]

    return kernel


def restemp_block_forward(x, params, *, kernel_size, dilation, eps=1e-5,
                          out_dtype=jnp.bfloat16, l_tile=None):
    """x: (N, C_in, L) float32 (PyTorch NCL layout). Returns (N, C_out, L)."""
    N, C_in, L = x.shape
    K = kernel_size
    pad = (K - 1) * dilation
    assert pad >= 1, "kernel_size/dilation must give a receptive field > 1"
    C_out = params["w1"].shape[0]
    has_downsample = params.get("wd") is not None
    if not has_downsample:
        assert C_in == C_out, "downsample=None requires C_in == C_out"

    # ---- parameter prep (plain JAX glue): fold eval-mode BN into the conv ----
    def fold(w, b, gamma, beta, mean, var):
        s = gamma / jnp.sqrt(var + eps)
        wf = w * s[:, None, None]                          # (C_out, C, K) scaled
        shift = b * s + beta - mean * s
        w_taps = jnp.transpose(wf, (2, 0, 1))              # (K, C_out, C), per-tap
        return (w_taps.astype(jnp.bfloat16),
                shift.reshape(-1, 1).astype(jnp.float32))

    w1t, t1 = fold(params["w1"], params["b1"], params["bn1_g"], params["bn1_b"],
                   params["bn1_m"], params["bn1_v"])
    w2t, t2 = fold(params["w2"], params["b2"], params["bn2_g"], params["bn2_b"],
                   params["bn2_m"], params["bn2_v"])
    if has_downsample:
        wd = params["wd"][:, :, 0].astype(jnp.bfloat16)             # (C_out, C_in)
        bd = params["bd"].reshape(C_out, 1).astype(jnp.float32)

    # ---- choose L tile from the per-step VMEM working set ----
    out_bytes = jnp.dtype(out_dtype).itemsize
    per_col = (2 * C_in * 2                     # double-buffered x input (bf16)
               + 2 * C_out * out_bytes          # double-buffered output
               + (C_in + C_out) * 2             # persistent halo scratch (bf16)
               + 3 * C_out * 4                  # f32 temporaries (acc/h2/res)
               + K * (C_in + C_out) * 2)        # shifted-slice temps for the dots
    if l_tile is not None:
        TL = l_tile if l_tile < L else L
    else:
        budget = 20 * 1024 * 1024
        tl_max = max(128, min((budget // per_col) // 128 * 128, 8192))
        TL = L if L <= tl_max else int(tl_max)
    n_lt = -(-L // TL)
    L_tot = n_lt * TL

    # only raise the scoped VMEM limit if the working set actually needs it
    vmem_est = per_col * TL + 4 * K * C_out * (C_in + C_out) + (2 << 20)
    vmem_limit = None
    if vmem_est > 32 * 1024 * 1024:
        try:
            cap = int(pltpu.get_tpu_info().vmem_capacity_bytes * 3 // 4)
        except Exception:
            cap = 48 * 1024 * 1024
        vmem_limit = min(int(vmem_est), cap)

    x_bf = x.astype(jnp.bfloat16)
    if L_tot != L:
        x_bf = jnp.pad(x_bf, ((0, 0), (0, 0), (0, L_tot - L)))

    kernel = _make_kernel(K, dilation, pad, TL, has_downsample)
    const = lambda shape: pl.BlockSpec(shape, lambda n, t: (0,) * len(shape))

    in_specs = [
        pl.BlockSpec((None, C_in, TL), lambda n, t: (n, 0, t)),   # x (bf16)
        const((K, C_out, C_in)),     # w1 per-tap (BN folded, bf16)
        const((C_out, 1)),           # shift1 (f32)
        const((K, C_out, C_out)),    # w2 per-tap (BN folded, bf16)
        const((C_out, 1)),           # shift2 (f32)
    ]
    args = [x_bf, w1t, t1, w2t, t2]
    if has_downsample:
        in_specs += [const((C_out, C_in)), const((C_out, 1))]
        args += [wd, bd]

    out = pl.pallas_call(
        kernel,
        out_shape=jax.ShapeDtypeStruct((N, C_out, L_tot), out_dtype),
        grid_spec=pltpu.PrefetchScalarGridSpec(
            num_scalar_prefetch=0,
            grid=(N, n_lt),
            in_specs=in_specs,
            out_specs=pl.BlockSpec((None, C_out, TL), lambda n, t: (n, 0, t)),
            scratch_shapes=[
                pltpu.VMEM((C_in, pad + TL), jnp.bfloat16),   # x halo + tile
                pltpu.VMEM((C_out, pad + TL), jnp.bfloat16),  # h1 halo + tile
            ],
        ),
        compiler_params=pltpu.CompilerParams(
            dimension_semantics=("parallel", "arbitrary"),
            vmem_limit_bytes=vmem_limit),
    )(*args)

    return out[:, :, :L] if L_tot != L else out


def reference_forward(x, params, *, kernel_size, dilation, eps=1e-5):
    """Pure-JAX f32 reference mirroring the PyTorch module (eval mode)."""
    pad = (kernel_size - 1) * dilation
    dn = ("NCH", "OIH", "NCH")

    def conv_block(h, w, b, g, be, m, v):
        y = lax.conv_general_dilated(h, w, window_strides=(1,),
                                     padding=[(pad, 0)],
                                     rhs_dilation=(dilation,),
                                     dimension_numbers=dn)
        y = y + b[None, :, None]
        y = (y - m[None, :, None]) / jnp.sqrt(v[None, :, None] + eps)
        y = y * g[None, :, None] + be[None, :, None]
        return jnp.maximum(y, 0.0)

    out = conv_block(x, params["w1"], params["b1"], params["bn1_g"],
                     params["bn1_b"], params["bn1_m"], params["bn1_v"])
    out = conv_block(out, params["w2"], params["b2"], params["bn2_g"],
                     params["bn2_b"], params["bn2_m"], params["bn2_v"])
    if params.get("wd") is not None:
        res = lax.conv_general_dilated(x, params["wd"], (1,), [(0, 0)],
                                       dimension_numbers=dn)
        res = res + params["bd"][None, :, None]
    else:
        res = x
    return jnp.maximum(out + res, 0.0)


def _make_params(key, C_in, C_out, K, with_downsample):
    ks = jax.random.split(key, 14)
    p = {
        "w1": 0.2 * jax.random.normal(ks[0], (C_out, C_in, K), jnp.float32),
        "b1": 0.1 * jax.random.normal(ks[1], (C_out,), jnp.float32),
        "bn1_g": 1.0 + 0.1 * jax.random.normal(ks[2], (C_out,), jnp.float32),
        "bn1_b": 0.1 * jax.random.normal(ks[3], (C_out,), jnp.float32),
        "bn1_m": 0.1 * jax.random.normal(ks[4], (C_out,), jnp.float32),
        "bn1_v": 0.5 + jax.random.uniform(ks[5], (C_out,), jnp.float32),
        "w2": 0.2 * jax.random.normal(ks[6], (C_out, C_out, K), jnp.float32),
        "b2": 0.1 * jax.random.normal(ks[7], (C_out,), jnp.float32),
        "bn2_g": 1.0 + 0.1 * jax.random.normal(ks[8], (C_out,), jnp.float32),
        "bn2_b": 0.1 * jax.random.normal(ks[9], (C_out,), jnp.float32),
        "bn2_m": 0.1 * jax.random.normal(ks[10], (C_out,), jnp.float32),
        "bn2_v": 0.5 + jax.random.uniform(ks[11], (C_out,), jnp.float32),
    }
    if with_downsample:
        p["wd"] = 0.2 * jax.random.normal(ks[12], (C_out, C_in, 1), jnp.float32)
        p["bd"] = 0.1 * jax.random.normal(ks[13], (C_out,), jnp.float32)
    else:
        p["wd"] = None
        p["bd"] = None
    return p


if __name__ == "__main__":
    key = jax.random.PRNGKey(0)
    k_par, k_x = jax.random.split(key)

    cases = [
        # (N, C_in, C_out, L, K, dilation, l_tile_override)
        (2, 4, 8, 16, 3, 2, None),    # downsample (1x1 conv) residual, single tile
        (2, 8, 8, 16, 3, 2, None),    # identity residual (downsample is None)
        (1, 4, 8, 384, 3, 2, 128),    # multiple L tiles -> exercises the causal carry
    ]

    for idx, (N, C_in, C_out, L, K, DIL, LT) in enumerate(cases):
        kp = jax.random.fold_in(k_par, idx)
        kx = jax.random.fold_in(k_x, idx)
        params = _make_params(kp, C_in, C_out, K, with_downsample=(C_in != C_out))
        x = jax.random.normal(kx, (N, C_in, L), jnp.float32)

        out = restemp_block_forward(x, params, kernel_size=K, dilation=DIL,
                                    l_tile=LT)
        out = jax.block_until_ready(out)

        ref = reference_forward(x, params, kernel_size=K, dilation=DIL)
        # bf16 MXU operands / bf16 output (f32 accumulation) -> relaxed tolerance.
        np.testing.assert_allclose(np.asarray(out, dtype=np.float32),
                                   np.asarray(ref), rtol=5e-2, atol=5e-2)

    print("KERNEL_OK")
</pallas_src>

<mosaic_0001>
module attributes {stable_mosaic.version = 11 : i64} {
  func.func @kernel(%arg0: i32, %arg1: i32, %arg2: memref<1x4x16xbf16, #tpu.memory_space<vmem>>, %arg3: memref<3x8x4xbf16, #tpu.memory_space<vmem>>, %arg4: memref<8x1xf32, #tpu.memory_space<vmem>>, %arg5: memref<3x8x8xbf16, #tpu.memory_space<vmem>>, %arg6: memref<8x1xf32, #tpu.memory_space<vmem>>, %arg7: memref<8x4xbf16, #tpu.memory_space<vmem>>, %arg8: memref<8x1xf32, #tpu.memory_space<vmem>>, %arg9: memref<1x8x16xbf16, #tpu.memory_space<vmem>>, %arg10: memref<4x20xbf16, #tpu.memory_space<vmem>>, %arg11: memref<8x20xbf16, #tpu.memory_space<vmem>>) attributes {dimension_semantics = [#tpu.dimension_semantics<parallel>, #tpu.dimension_semantics<arbitrary>], iteration_bounds = array<i64: 2, 1>, scalar_prefetch = 0 : i64, scratch_operands = 2 : i64, tpu.core_type = #tpu.core_type<tc>, window_params = [{transform_indices = @transform_0, window_bounds = array<i64: 1, 4, 16>}, {pipeline_mode = #tpu.pipeline_mode<synchronous>, transform_indices = @transform_1, window_bounds = array<i64: 3, 8, 4>}, {pipeline_mode = #tpu.pipeline_mode<synchronous>, transform_indices = @transform_2, window_bounds = array<i64: 8, 1>}, {pipeline_mode = #tpu.pipeline_mode<synchronous>, transform_indices = @transform_3, window_bounds = array<i64: 3, 8, 8>}, {pipeline_mode = #tpu.pipeline_mode<synchronous>, transform_indices = @transform_4, window_bounds = array<i64: 8, 1>}, {pipeline_mode = #tpu.pipeline_mode<synchronous>, transform_indices = @transform_5, window_bounds = array<i64: 8, 4>}, {pipeline_mode = #tpu.pipeline_mode<synchronous>, transform_indices = @transform_6, window_bounds = array<i64: 8, 1>}, {transform_indices = @transform_7, window_bounds = array<i64: 1, 8, 16>}]} {
    %c0_i32 = arith.constant 0 : i32
    %0 = arith.cmpi eq, %arg1, %c0_i32 : i32
    %1 = arith.extui %0 : i1 to i32
    %c0_i32_0 = arith.constant 0 : i32
    %2 = arith.cmpi ne, %1, %c0_i32_0 : i32
    scf.if %2 {
      %cst_61 = arith.constant 0.000000e+00 : bf16
      %62 = vector.broadcast %cst_61 : bf16 to vector<4x4xbf16>
      %c0_62 = arith.constant 0 : index
      %c0_63 = arith.constant 0 : index
      %63 = vector.load %arg10[%c0_62, %c0_63] : memref<4x20xbf16, #tpu.memory_space<vmem>>, vector<4x4xbf16>
      tpu.vector_store %arg10[%c0_62, %c0_63], %62 {strides = array<i32>} : memref<4x20xbf16, #tpu.memory_space<vmem>>, vector<4x4xbf16>,
      %cst_64 = arith.constant 0.000000e+00 : bf16
      %64 = vector.broadcast %cst_64 : bf16 to vector<8x4xbf16>
      %c0_65 = arith.constant 0 : index
      %c0_66 = arith.constant 0 : index
      %65 = vector.load %arg11[%c0_65, %c0_66] : memref<8x20xbf16, #tpu.memory_space<vmem>>, vector<8x4xbf16>
      tpu.vector_store %arg11[%c0_65, %c0_66], %64 {strides = array<i32>} : memref<8x20xbf16, #tpu.memory_space<vmem>>, vector<8x4xbf16>,
    } else {
    }
    %c0 = arith.constant 0 : index
    %c0_1 = arith.constant 0 : index
    %c0_2 = arith.constant 0 : index
    %3 = vector.load %arg2[%c0, %c0_1, %c0_2] : memref<1x4x16xbf16, #tpu.memory_space<vmem>>, vector<1x4x16xbf16>
    %4 = vector.shape_cast %3 : vector<1x4x16xbf16> to vector<4x16xbf16>
    %c0_3 = arith.constant 0 : index
    %c4 = arith.constant 4 : index
    %5 = vector.load %arg10[%c0_3, %c4] : memref<4x20xbf16, #tpu.memory_space<vmem>>, vector<4x16xbf16>
    tpu.vector_store %arg10[%c0_3, %c4], %4 {strides = array<i32>} : memref<4x20xbf16, #tpu.memory_space<vmem>>, vector<4x16xbf16>,
    %c0_4 = arith.constant 0 : index
    %c0_5 = arith.constant 0 : index
    %c0_6 = arith.constant 0 : index
    %6 = vector.load %arg3[%c0_4, %c0_5, %c0_6] : memref<3x8x4xbf16, #tpu.memory_space<vmem>>, vector<1x8x4xbf16>
    %7 = vector.shape_cast %6 : vector<1x8x4xbf16> to vector<8x4xbf16>
    %c0_7 = arith.constant 0 : index
    %c0_8 = arith.constant 0 : index
    %8 = vector.load %arg10[%c0_7, %c0_8] : memref<4x20xbf16, #tpu.memory_space<vmem>>, vector<4x16xbf16>
    %cst = arith.constant dense<0.000000e+00> : vector<8x16xf32>
    %9 = tpu.matmul %7, %8, %cst {dimension_numbers = #tpu.dot_dimension_numbers<[1], [0], [0], [1], [0, 0, 1, 1], [], []>} : vector<8x4xbf16>, vector<4x16xbf16>, vector<8x16xf32> -> vector<8x16xf32>
    %c1 = arith.constant 1 : index
    %c0_9 = arith.constant 0 : index
    %c0_10 = arith.constant 0 : index
    %10 = vector.load %arg3[%c1, %c0_9, %c0_10] : memref<3x8x4xbf16, #tpu.memory_space<vmem>>, vector<1x8x4xbf16>
    %11 = vector.shape_cast %10 : vector<1x8x4xbf16> to vector<8x4xbf16>
    %c0_11 = arith.constant 0 : index
    %c2 = arith.constant 2 : index
    %12 = vector.load %arg10[%c0_11, %c2] : memref<4x20xbf16, #tpu.memory_space<vmem>>, vector<4x16xbf16>
    %cst_12 = arith.constant dense<0.000000e+00> : vector<8x16xf32>
    %13 = tpu.matmul %11, %12, %cst_12 {dimension_numbers = #tpu.dot_dimension_numbers<[1], [0], [0], [1], [0, 0, 1, 1], [], []>} : vector<8x4xbf16>, vector<4x16xbf16>, vector<8x16xf32> -> vector<8x16xf32>
    %14 = arith.addf %9, %13 : vector<8x16xf32>
    %c2_13 = arith.constant 2 : index
    %c0_14 = arith.constant 0 : index
    %c0_15 = arith.constant 0 : index
    %15 = vector.load %arg3[%c2_13, %c0_14, %c0_15] : memref<3x8x4xbf16, #tpu.memory_space<vmem>>, vector<1x8x4xbf16>
    %16 = vector.shape_cast %15 : vector<1x8x4xbf16> to vector<8x4xbf16>
    %c0_16 = arith.constant 0 : index
    %c4_17 = arith.constant 4 : index
    %17 = vector.load %arg10[%c0_16, %c4_17] : memref<4x20xbf16, #tpu.memory_space<vmem>>, vector<4x16xbf16>
    %cst_18 = arith.constant dense<0.000000e+00> : vector<8x16xf32>
    %18 = tpu.matmul %16, %17, %cst_18 {dimension_numbers = #tpu.dot_dimension_numbers<[1], [0], [0], [1], [0, 0, 1, 1], [], []>} : vector<8x4xbf16>, vector<4x16xbf16>, vector<8x16xf32> -> vector<8x16xf32>
    %19 = arith.addf %14, %18 : vector<8x16xf32>
    %c0_19 = arith.constant 0 : index
    %c0_20 = arith.constant 0 : index
    %20 = vector.load %arg4[%c0_19, %c0_20] : memref<8x1xf32, #tpu.memory_space<vmem>>, vector<8x1xf32>
    %21 = vector.broadcast %20 : vector<8x1xf32> to vector<8x16xf32>
    %22 = arith.addf %19, %21 : vector<8x16xf32>
    %cst_21 = arith.constant 0.000000e+00 : f32
    %23 = vector.broadcast %cst_21 : f32 to vector<8x16xf32>
    %24 = arith.maximumf %22, %23 : vector<8x16xf32>
    %25 = arith.truncf %24 : vector<8x16xf32> to vector<8x16xbf16>
    %c0_22 = arith.constant 0 : index
    %c4_23 = arith.constant 4 : index
    %26 = vector.load %arg11[%c0_22, %c4_23] : memref<8x20xbf16, #tpu.memory_space<vmem>>, vector<8x16xbf16>
    tpu.vector_store %arg11[%c0_22, %c4_23], %25 {strides = array<i32>} : memref<8x20xbf16, #tpu.memory_space<vmem>>, vector<8x16xbf16>,
    %c0_24 = arith.constant 0 : index
    %c0_25 = arith.constant 0 : index
    %c0_26 = arith.constant 0 : index
    %27 = vector.load %arg5[%c0_24, %c0_25, %c0_26] : memref<3x8x8xbf16, #tpu.memory_space<vmem>>, vector<1x8x8xbf16>
    %28 = vector.shape_cast %27 : vector<1x8x8xbf16> to vector<8x8xbf16>
    %c0_27 = arith.constant 0 : index
    %c0_28 = arith.constant 0 : index
    %29 = vector.load %arg11[%c0_27, %c0_28] : memref<8x20xbf16, #tpu.memory_space<vmem>>, vector<8x16xbf16>
    %cst_29 = arith.constant dense<0.000000e+00> : vector<8x16xf32>
    %30 = tpu.matmul %28, %29, %cst_29 {dimension_numbers = #tpu.dot_dimension_numbers<[1], [0], [0], [1], [0, 0, 1, 1], [], []>} : vector<8x8xbf16>, vector<8x16xbf16>, vector<8x16xf32> -> vector<8x16xf32>
    %c1_30 = arith.constant 1 : index
    %c0_31 = arith.constant 0 : index
    %c0_32 = arith.constant 0 : index
    %31 = vector.load %arg5[%c1_30, %c0_31, %c0_32] : memref<3x8x8xbf16, #tpu.memory_space<vmem>>, vector<1x8x8xbf16>
    %32 = vector.shape_cast %31 : vector<1x8x8xbf16> to vector<8x8xbf16>
    %c0_33 = arith.constant 0 : index
    %c2_34 = arith.constant 2 : index
    %33 = vector.load %arg11[%c0_33, %c2_34] : memref<8x20xbf16, #tpu.memory_space<vmem>>, vector<8x16xbf16>
    %cst_35 = arith.constant dense<0.000000e+00> : vector<8x16xf32>
    %34 = tpu.matmul %32, %33, %cst_35 {dimension_numbers = #tpu.dot_dimension_numbers<[1], [0], [0], [1], [0, 0, 1, 1], [], []>} : vector<8x8xbf16>, vector<8x16xbf16>, vector<8x16xf32> -> vector<8x16xf32>
    %35 = arith.addf %30, %34 : vector<8x16xf32>
    %c2_36 = arith.constant 2 : index
    %c0_37 = arith.constant 0 : index
    %c0_38 = arith.constant 0 : index
    %36 = vector.load %arg5[%c2_36, %c0_37, %c0_38] : memref<3x8x8xbf16, #tpu.memory_space<vmem>>, vector<1x8x8xbf16>
    %37 = vector.shape_cast %36 : vector<1x8x8xbf16> to vector<8x8xbf16>
    %c0_39 = arith.constant 0 : index
    %c4_40 = arith.constant 4 : index
    %38 = vector.load %arg11[%c0_39, %c4_40] : memref<8x20xbf16, #tpu.memory_space<vmem>>, vector<8x16xbf16>
    %cst_41 = arith.constant dense<0.000000e+00> : vector<8x16xf32>
    %39 = tpu.matmul %37, %38, %cst_41 {dimension_numbers = #tpu.dot_dimension_numbers<[1], [0], [0], [1], [0, 0, 1, 1], [], []>} : vector<8x8xbf16>, vector<8x16xbf16>, vector<8x16xf32> -> vector<8x16xf32>
    %40 = arith.addf %35, %39 : vector<8x16xf32>
    %c0_42 = arith.constant 0 : index
    %c0_43 = arith.constant 0 : index
    %41 = vector.load %arg6[%c0_42, %c0_43] : memref<8x1xf32, #tpu.memory_space<vmem>>, vector<8x1xf32>
    %42 = vector.broadcast %41 : vector<8x1xf32> to vector<8x16xf32>
    %43 = arith.addf %40, %42 : vector<8x16xf32>
    %cst_44 = arith.constant 0.000000e+00 : f32
    %44 = vector.broadcast %cst_44 : f32 to vector<8x16xf32>
    %45 = arith.maximumf %43, %44 : vector<8x16xf32>
    %c0_45 = arith.constant 0 : index
    %c0_46 = arith.constant 0 : index
    %46 = vector.load %arg7[%c0_45, %c0_46] : memref<8x4xbf16, #tpu.memory_space<vmem>>, vector<8x4xbf16>
    %cst_47 = arith.constant dense<0.000000e+00> : vector<8x16xf32>
    %47 = tpu.matmul %46, %4, %cst_47 {dimension_numbers = #tpu.dot_dimension_numbers<[1], [0], [0], [1], [0, 0, 1, 1], [], []>} : vector<8x4xbf16>, vector<4x16xbf16>, vector<8x16xf32> -> vector<8x16xf32>
    %c0_48 = arith.constant 0 : index
    %c0_49 = arith.constant 0 : index
    %48 = vector.load %arg8[%c0_48, %c0_49] : memref<8x1xf32, #tpu.memory_space<vmem>>, vector<8x1xf32>
    %49 = vector.broadcast %48 : vector<8x1xf32> to vector<8x16xf32>
    %50 = arith.addf %47, %49 : vector<8x16xf32>
    %51 = arith.addf %45, %50 : vector<8x16xf32>
    %cst_50 = arith.constant 0.000000e+00 : f32
    %52 = vector.broadcast %cst_50 : f32 to vector<8x16xf32>
    %53 = arith.maximumf %51, %52 : vector<8x16xf32>
    %54 = arith.truncf %53 : vector<8x16xf32> to vector<8x16xbf16>
    %c0_51 = arith.constant 0 : index
    %c0_52 = arith.constant 0 : index
    %c0_53 = arith.constant 0 : index
    %55 = vector.load %arg9[%c0_51, %c0_52, %c0_53] : memref<1x8x16xbf16, #tpu.memory_space<vmem>>, vector<1x8x16xbf16>
    %56 = vector.shape_cast %55 : vector<1x8x16xbf16> to vector<8x16xbf16>
    %57 = vector.shape_cast %54 : vector<8x16xbf16> to vector<1x8x16xbf16>
    tpu.vector_store %arg9[%c0_51, %c0_52, %c0_53], %57 {strides = array<i32>} : memref<1x8x16xbf16, #tpu.memory_space<vmem>>, vector<1x8x16xbf16>,
    %c0_54 = arith.constant 0 : index
    %c16 = arith.constant 16 : index
    %58 = vector.load %arg10[%c0_54, %c16] : memref<4x20xbf16, #tpu.memory_space<vmem>>, vector<4x4xbf16>
    %c0_55 = arith.constant 0 : index
    %c0_56 = arith.constant 0 : index
    %59 = vector.load %arg10[%c0_55, %c0_56] : memref<4x20xbf16, #tpu.memory_space<vmem>>, vector<4x4xbf16>
    tpu.vector_store %arg10[%c0_55, %c0_56], %58 {strides = array<i32>} : memref<4x20xbf16, #tpu.memory_space<vmem>>, vector<4x4xbf16>,
    %c0_57 = arith.constant 0 : index
    %c16_58 = arith.constant 16 : index
    %60 = vector.load %arg11[%c0_57, %c16_58] : memref<8x20xbf16, #tpu.memory_space<vmem>>, vector<8x4xbf16>
    %c0_59 = arith.constant 0 : index
    %c0_60 = arith.constant 0 : index
    %61 = vector.load %arg11[%c0_59, %c0_60] : memref<8x20xbf16, #tpu.memory_space<vmem>>, vector<8x4xbf16>
    tpu.vector_store %arg11[%c0_59, %c0_60], %60 {strides = array<i32>} : memref<8x20xbf16, #tpu.memory_space<vmem>>, vector<8x4xbf16>,
    return
  }
  func.func @transform_0(%arg0: i32, %arg1: i32) -> (i32, i32, i32) {
    %c0_i32 = arith.constant 0 : i32
    %c0_i32_0 = arith.constant 0 : i32
    return %arg0, %c0_i32, %arg1 : i32, i32, i32
  }
  func.func @transform_1(%arg0: i32, %arg1: i32) -> (i32, i32, i32) {
    %c0_i32 = arith.constant 0 : i32
    %c0_i32_0 = arith.constant 0 : i32
    %c0_i32_1 = arith.constant 0 : i32
    %c0_i32_2 = arith.constant 0 : i32
    return %c0_i32, %c0_i32_0, %c0_i32_1 : i32, i32, i32
  }
  func.func @transform_2(%arg0: i32, %arg1: i32) -> (i32, i32) {
    %c0_i32 = arith.constant 0 : i32
    %c0_i32_0 = arith.constant 0 : i32
    %c0_i32_1 = arith.constant 0 : i32
    return %c0_i32, %c0_i32_0 : i32, i32
  }
  func.func @transform_3(%arg0: i32, %arg1: i32) -> (i32, i32, i32) {
    %c0_i32 = arith.constant 0 : i32
    %c0_i32_0 = arith.constant 0 : i32
    %c0_i32_1 = arith.constant 0 : i32
    %c0_i32_2 = arith.constant 0 : i32
    return %c0_i32, %c0_i32_0, %c0_i32_1 : i32, i32, i32
  }
  func.func @transform_4(%arg0: i32, %arg1: i32) -> (i32, i32) {
    %c0_i32 = arith.constant 0 : i32
    %c0_i32_0 = arith.constant 0 : i32
    %c0_i32_1 = arith.constant 0 : i32
    return %c0_i32, %c0_i32_0 : i32, i32
  }
  func.func @transform_5(%arg0: i32, %arg1: i32) -> (i32, i32) {
    %c0_i32 = arith.constant 0 : i32
    %c0_i32_0 = arith.constant 0 : i32
    %c0_i32_1 = arith.constant 0 : i32
    return %c0_i32, %c0_i32_0 : i32, i32
  }
  func.func @transform_6(%arg0: i32, %arg1: i32) -> (i32, i32) {
    %c0_i32 = arith.constant 0 : i32
    %c0_i32_0 = arith.constant 0 : i32
    %c0_i32_1 = arith.constant 0 : i32
    return %c0_i32, %c0_i32_0 : i32, i32
  }
  func.func @transform_7(%arg0: i32, %arg1: i32) -> (i32, i32, i32) {
    %c0_i32 = arith.constant 0 : i32
    %c0_i32_0 = arith.constant 0 : i32
    return %arg0, %c0_i32, %arg1 : i32, i32, i32
  }
}

</mosaic_0001>

<bundles_post_ra>
// kernel: tpu_custom_call.1
= control target key start
LH: loop header
LB: loop body
LE: loop exit
PB: predicated region body
PF: predicated region fallthrough
CT: control target
= control target key end

     0   :  { %12 = vsyncpa [#allocation5], 0  ;;  %s1273_s0 = inlined_call_operand.vmem [shape: bf16[2,4,16], index: 0, kind: input, shape index: {}]   ;;  %s1274_s1 = inlined_call_operand.vmem [shape: bf16[3,8,4], index: 1, kind: input, shape index: {}]   ;;  %s1275_s2 = inlined_call_operand.vmem [shape: f32[8,1], index: 2, kind: input, shape index: {}]   ;;  %s1276_s3 = inlined_call_operand.vmem [shape: bf16[3,8,8], index: 3, kind: input, shape index: {}]   ;;  %s1277_s4 = inlined_call_operand.vmem [shape: f32[8,1], index: 4, kind: input, shape index: {}]   ;;  %s1278_s5 = inlined_call_operand.vmem [shape: bf16[8,4], index: 5, kind: input, shape index: {}]   ;;  %s1279_s6 = inlined_call_operand.vmem [shape: f32[8,1], index: 6, kind: input, shape index: {}]   ;;  %s1280_s7 = inlined_call_operand.hbm [shape: bf16[2,8,16], index: 7, kind: output, shape index: {}]  }
   0x1   :  { %14 = vsyncpa [#allocation5 + $0x1], 0  ;;  %s1095_s24 = smov 0   ;;  %s1097_s25 = smov 0  }
   0x2   :  { %s1099_s26 = smov 0   ;;  %s1101_s27 = smov 0  }
   0x3   :  { %s1103_s28 = smov 0   ;;  %s1105_s29 = smov 0  }
   0x4 LB: > { %s820_s30 = sadd.s32 4294967295, %s1044_s29   ;;  %s821_s8 = sadd.s32 4294967294, %s1044_s29   ;;  %s1044_s29 = sphi %s1105_s29, %s20_s29   ;;  %s1040_s28 = sphi %s1103_s28, %s1287_s28   ;;  %s1036_s27 = sphi %s1101_s27, %s1286_s27   ;;  %s1032_s26 = sphi %s1099_s26, %s1285_s26   ;;  %s1028_s25 = sphi %s1097_s25, %s1284_s25   ;;  %s1024_s24 = sphi %s1095_s24, %s1283_s24  }
   0x5   : > { %s32_s9 = sadd.s32 1, %s1040_s28  ;;  %s195_s10 = sadd.s32 1, %s1032_s26 }
   0x6   : > { %p34_p0 = scmp.ge.s32.totalorder %s32_s9, 2  ;;  %p205_p1 = scmp.ne.s32.totalorder %s1032_s26, %s1028_s25 }
   0x7   : > { %p206_p2 = scmp.eq.s32.totalorder %s820_s30, 1  ;;  %p211_p3 = scmp.ne.s32.totalorder %s1028_s25, %s1024_s24 }
   0x8   : > { %s1289_s9 = smov (%p34_p0, %s32_s9), 0  ;;  %p212_p5 = scmp.eq.s32.totalorder %s821_s8, 1 }
   0x9   : > { %p1135_p4 = por %p206_p2, %p205_p1  ;;  %s190_s12 = ssub.s32 %s1040_s28, %s1289_s9 }
   0xa   : > { %p824_p6 = scmp.ge.s32.totalorder %s1044_s29, 1  ;;  %p193_p7 = scmp.eq.s32.totalorder %s190_s12, 0 }
   0xb   : > { %p1142_p8 = por %p212_p5, %p211_p3  ;;  %p258_p9 = scmp.lt.s32.totalorder %s1044_s29, 3 }
   0xc   : > { %s1148_s14 = scalar_select %p193_p7, %s1032_s26, %s195_s10  }
   0xd   : > { %p259_p10 = pnand %p824_p6, %p258_p9 }
   0xe   : > { %p292_p11 = scmp.lt.s32.totalorder (!%p259_p10), %s1036_s27, 1  ;;  %s1048_s20 = smov (!%p259_p10), 4  }
   0xf   : > { %262 = sbr.rel (%p259_p10) target bundleno = 949 (0x3b5), region = 48  ;;  %s1051_s21 = smov (!%p259_p10), 124  }
  0x10   : > { %s1052_s10 = smov (!%p259_p10), 126   ;;  %s289_s18 = sand.u32 (!%p259_p10), 1, %s1028_s25  }
  0x14   : > { %vm304_vm0 = vcmask 25600   ;;  %v1046_v0 = vmov 0   ;;  %s293_s15 = scalar_select %p292_p11, %s1036_s27, 1  ;;  %v1047_v1 = vmov 0.0   ;;  %v1049_v3 = vmov 1983009808  }
  0x15   : > { %305 = vst.msk [vmem:[#allocation2] sm:$0x3] %vm304_vm0, %v1046_v0  ;;  %965 = vset.pattern.permute.xlu1 %v1046_v0  ;;  %966 = vset.pattern.permute.xlu0 %v1046_v0  ;;  %v321_v4 = vunpack.c.l.s4 %v1049_v3  ;;  %v323_v5 = vlaneseq  ;;  %vm313_vm1 = vcmask 156704   ;;  %vm1050_vm2 = vmmov 0   ;;  %v315_v14 = vld [vmem:[%s1274_s1] sm:$0xf] }
  0x16   : > { %866 = vmatprep.subr.bf16.mxu1 %v1047_v1  ;;  %860 = vmatprep.subr.bf16.mxu0 %v1047_v1  ;;  %s826_s16 = sshll.u32 %s293_s15, 1  ;;  %vm333_vm3 = vcmask 1041408   ;;  %vm329_vm4 = vcmask 31744   ;;  %v483_v15 = vld [vmem:[%s1275_s2] sm:$0xff]  ;;  %v830_v21 = vld [vmem:[%s1274_s1 + $0x8] sm:$0xf] }
  0x17   : > { %s298_s19 = scalar_lea.vmem %s1273_s0, %s826_s16  ;;  %862 = vmatprep.mubr.msk.bf16.mxu0 %vm1050_vm2, %v1047_v1  ;;  %868 = vmatprep.mubr.msk.bf16.mxu1 %vm1050_vm2, %v1047_v1  ;;  %v322_v7 = vunpack.c.0.s8 %v321_v4  ;;  %v324_v8 = vshrl.u32 %v323_v5, 7  ;;  %v827_v19 = vld [vmem:[%s1274_s1 + $0x4] sm:$0xf]  ;;  %vm306_vm5 = vcmask 27648   ;;  %vm498_vm6 = vcmask 158752   ;;  %s1054_s15 = smov [#allocation4]  }
  0x18   : > { %v1158_v2 = vld [vmem:[%s298_s19] sm:$0x3]  ;;  %307 = vst.msk [vmem:[#allocation3] sm:$0xf] %vm306_vm5, %v1046_v0  ;;  %vm513_vm7 = vcmask 1043456   ;;  %vm509_vm8 = vcmask 64512  }
  0x19   : > { %310 = vrot.lane.b32.xlu0 %v1158_v2, %s1048_s20  ;;  %v325_v9 = vsub.s32 %v322_v7, %v324_v8  ;;  %v500_v44 = vld [vmem:[%s1276_s3] sm:$0xf]  ;;  %v673_v45 = vsel %vm333_vm3, %v1158_v2, 0  ;;  %v834_v54 = vld [vmem:[%s1276_s3 + $0x4] sm:$0xf]  ;;  %s825_s19 = sshll.u32 %s289_s18, 2 }
  0x1a   : > { %v654_v46 = vld [vmem:[%s1277_s4] sm:$0xff]  ;;  %v838_v56 = vld [vmem:[%s1276_s3 + $0x8] sm:$0xf]  ;;  %s291_s22 = scalar_lea.vmem [#allocation4], %s825_s19  ;;  %vm718_vm9 = vcmask 125952   ;;  %s972_s16 = sshll.u32 %s1054_s15, 4  ;;  %s973_s16 = int_to_ptr.vmem [resolvable:$false] %s972_s16 }
  0x1b   : > { %v662_v48 = vld [vmem:[%s1278_s5] sm:$0xf]  ;;  %s749_s23 = sshll.u32 %s291_s22, 4  ;;  %s750_s23 = int_to_ptr.vmem [resolvable:$true] %s749_s23 }
  0x1c   : > { %v663_v49 = vld [vmem:[%s1279_s6] sm:$0xff]  ;;  %s968_s12 = scalar_lea.vmem %s750_s23, 64  ;;  %p975_p1 = scmp.lt.s32.totalorder %s750_s23, %s973_s16 }
  0x1d   : > { %p969_p12 = scmp.ne.s32.totalorder %s750_s23, %s968_s12 }
  0x1f   : > { %p970_p13 = pnand %p969_p12, %p1135_p4 }
  0x21   : > { %p971_p0 = pneg %p970_p13 }
  0x8b   : > { %v311_v6 = vpop.permute.xlu0 %310 }
  0x8c   : > { %314 = vst.msk [vmem:[#allocation2] sm:$0x3] %vm313_vm1, %v311_v6 }
  0x93   : > { %v831_v10 = vld.sshfl [vmem:[#allocation2] sm:$0x3 pattern:$0x76325410] }
  0x94   : > { %v316_v11 = vld [vmem:[#allocation2] sm:$0x3]  ;;  %434 = vrot.lane.b32.xlu1 %v831_v10, %s1051_s21 }
  0x95   : > { %v381_v12 = vsel %vm333_vm3, %v316_v11, 0  ;;  %v326_v13 = vrot.slane %v316_v11, %v325_v9  ;;  %v720_v47 = vld [vmem:[#allocation2] sm:$0x3] }
  0x96   : > { %867 = vmatpush3.bf16.msra.mxu1 %v381_v12 }
  0x97   : > { %327 = vrot.lane.b32.xlu0 %v326_v13, %s1052_s10  ;;  %878 = vmatprep.subr.bf16.mxu1 %v1047_v1 }
  0x98   : > { %486 = vperm.xlu1 %965, %v483_v15  }
  0x99   : > { %869 = vmatmul.mubr.msk.bf16.vlgmr.msra.gmra.mxu1 %vm329_vm4, %v315_v14 }
  0x9a   : > { %880 = vmatprep.mubr.msk.bf16.mxu1 %vm1050_vm2, %v1047_v1 }
 0x106   : > { %v435_v18 = vpop.permute.xlu1 %434 }
 0x107   : > { %v440_v20 = vsel %vm333_vm3, %v435_v18, 0 }
 0x109   : > { %v328_v16 = vpop.permute.xlu0 %327 }
 0x10a   : > { %v335_v17 = vsel %vm333_vm3, %v328_v16, 0 }
 0x10b   : > { %861 = vmatpush3.bf16.msra.mxu0 %v335_v17 }
 0x10c   : > { %872 = vmatprep.subr.bf16.mxu0 %v1047_v1 }
 0x10e   : > { %863 = vmatmul.mubr.msk.bf16.vlgmr.msra.gmra.mxu0 %vm329_vm4, %v827_v19 }
 0x10f   : > { %873 = vmatpush3.bf16.msra.mxu0 %v440_v20  ;;  %874 = vmatprep.mubr.msk.bf16.mxu0 %vm1050_vm2, %v1047_v1 }
 0x110   : > { %884 = vmatprep.subr.bf16.mxu0 %v1047_v1 }
 0x113   : > { %v487_v32 = vpop.permute.xlu1 %486 }
 0x116   : > { %875 = vmatmul.mubr.msk.bf16.vlgmr.msra.gmra.mxu0 %vm329_vm4, %v830_v21 }
 0x117   : > { %886 = vmatprep.mubr.msk.bf16.mxu0 %vm1050_vm2, %v1047_v1 }
 0x159   : > { %v417_v22 = vpop.f32.mrf.mxu1 }
 0x15b   : > { %v870_v23 = vpop.f32.mrf.mxu1 }
 0x15d   : > { %v420_v24 = vpop.f32.mrf.mxu1 }
 0x15f   : > { %v871_v25 = vpop.f32.mrf.mxu1 }
 0x1ce   : > { %v371_v26 = vpop.f32.mrf.mxu0 }
 0x1cf   : > { %v418_v30 = vadd.f32 %v417_v22, %v371_v26 }
 0x1d0   : > { %v864_v27 = vpop.f32.mrf.mxu0 }
 0x1d2   : > { %v374_v28 = vpop.f32.mrf.mxu0 }
 0x1d4   : > { %v865_v29 = vpop.f32.mrf.mxu0 }
 0x1d6   : > { %v476_v31 = vpop.f32.mrf.mxu0 }
 0x1d7   : > { %v482_v33 = vadd.f32 %v476_v31, %v418_v30 }
 0x1d8   : > { %v876_v34 = vpop.f32.mrf.mxu0 }
 0x1d9   : > { %v489_v35 = vadd.f32 %v487_v32, %v482_v33 }
 0x1da   : > { %v479_v36 = vpop.f32.mrf.mxu0 }
 0x1db   : > { %v490_v37 = vmax.f32 %v489_v35, 0.0 }
 0x1dc   : > { %v877_v38 = vpop.f32.mrf.mxu0 }
 0x1dd   : > { %v845_v39 = vpack.c.bf16 %v490_v37, %v490_v37 }
 0x1df   : > { %495 = vrot.lane.b32.xlu0 %v845_v39, %s1048_s20  ;;  %s842_s20 = sshll.u32 %s1036_s27, 6  ;;  %s974_s27 = scalar_lea.vmem %s973_s16, 128 }
 0x1e0   : > { %s747_s8 = scalar_lea.hbm %s1280_s7, %s842_s20  ;;  %p976_p2 = scmp.lt.s32.totalorder %s974_s27, %s968_s12 }
 0x1e2   : > { %p977_p3 = por %p976_p2, %p975_p1 }
 0x1e4   : > { %p978_p5 = pnand %p977_p3, %p971_p0 }
 0x251   : > { %v496_v40 = vpop.permute.xlu0 %495 }
 0x252   : > { %499 = vst.msk [vmem:[#allocation3] sm:$0xf] %vm498_vm6, %v496_v40 }
 0x259   : > { %v501_v41 = vld [vmem:[#allocation3] sm:$0xf] }
 0x25a   : > { %v561_v42 = vsel %vm513_vm7, %v501_v41, 0  ;;  %v835_v43 = vcombine.low %v501_v41, %v501_v41  ;;  %v727_v50 = vld [vmem:[#allocation3] sm:$0xf] }
 0x25b   : > { %885 = vmatpush3.bf16.msra.mxu0 %v561_v42 }
 0x25c   : > { %605 = vrot.lane.b32.xlu0 %v835_v43, %s1051_s21  ;;  %507 = vrot.lane.b32.xlu1 %v835_v43, %s1052_s10  ;;  %s1053_s21 = smov 112   ;;  %s735_s10 = scalar_lea.sflag [#allocation5], %s289_s18 }
 0x25d   : > { %896 = vmatprep.subr.bf16.mxu0 %v1047_v1 }
 0x25e   : > { %887 = vmatmul.mubr.msk.bf16.vlgmr.msra.gmra.mxu0 %vm509_vm8, %v500_v44 }
 0x25f   : > { %897 = vmatpush3.bf16.msra.mxu0 %v673_v45  ;;  %898 = vmatprep.mubr.msk.bf16.mxu0 %vm1050_vm2, %v1047_v1 }
 0x260   : > { %657 = vperm.xlu1 %965, %v654_v46   ;;  %666 = vperm.xlu0 %966, %v663_v49  }
 0x264   : > { %722 = vrot.lane.b32.xlu1 %v720_v47, %s1053_s21 }
 0x266   : > { %899 = vmatmul.mubr.msk.bf16.vlgmr.msra.gmra.mxu0 %vm329_vm4, %v662_v48 }
 0x268   : > { %729 = vrot.lane.b32.xlu1 %v727_v50, %s1053_s21 }
 0x2ce   : > { %v508_v51 = vpop.permute.xlu1 %507  ;;  %v606_v53 = vpop.permute.xlu0 %605 }
 0x2cf   : > { %v515_v52 = vsel %vm513_vm7, %v508_v51, 0  ;;  %v611_v55 = vsel %vm513_vm7, %v606_v53, 0 }
 0x2d0   : > { %879 = vmatpush3.bf16.msra.mxu1 %v515_v52 }
 0x2d1   : > { %890 = vmatprep.subr.bf16.mxu1 %v1047_v1 }
 0x2d3   : > { %881 = vmatmul.mubr.msk.bf16.vlgmr.msra.gmra.mxu1 %vm509_vm8, %v834_v54 }
 0x2d4   : > { %891 = vmatpush3.bf16.msra.mxu1 %v611_v55  ;;  %892 = vmatprep.mubr.msk.bf16.mxu1 %vm1050_vm2, %v1047_v1 }
 0x2db   : > { %893 = vmatmul.mubr.msk.bf16.vlgmr.msra.gmra.mxu1 %vm509_vm8, %v838_v56  ;;  %v658_v57 = vpop.permute.xlu1 %657  ;;  %v667_v10 = vpop.permute.xlu0 %666 }
 0x2df   : > { %v723_v58 = vpop.permute.xlu1 %722 }
 0x2e0   : > { %726 = vst.msk [vmem:[#allocation2] sm:$0x3] %vm304_vm0, %v723_v58 }
 0x2e3   : > { %v730_v59 = vpop.permute.xlu1 %729 }
 0x2e4   : > { %733 = vst.msk [vmem:[#allocation3] sm:$0xf] %vm306_vm5, %v730_v59 }
 0x31e   : > { %v597_v60 = vpop.f32.mrf.mxu0 }
 0x320   : > { %v888_v61 = vpop.f32.mrf.mxu0 }
 0x322   : > { %v600_v62 = vpop.f32.mrf.mxu0 }
 0x324   : > { %v889_v63 = vpop.f32.mrf.mxu0 }
 0x326   : > { %v709_v0 = vpop.f32.mrf.mxu0 }
 0x327   : > { %v710_v14 = vadd.f32 %v709_v0, %v667_v10 }
 0x328   : > { %v900_v1 = vpop.f32.mrf.mxu0 }
 0x32a   : > { %v712_v2 = vpop.f32.mrf.mxu0 }
 0x32c   : > { %v901_v3 = vpop.f32.mrf.mxu0 }
 0x393   : > { %v551_v4 = vpop.f32.mrf.mxu1 }
 0x394   : > { %v598_v8 = vadd.f32 %v597_v60, %v551_v4 }
 0x395   : > { %v882_v5 = vpop.f32.mrf.mxu1 }
 0x397   : > { %v554_v6 = vpop.f32.mrf.mxu1 }
 0x399   : > { %v883_v7 = vpop.f32.mrf.mxu1 }
 0x39b   : > { %v647_v9 = vpop.f32.mrf.mxu1 }
 0x39c   : > { %v653_v11 = vadd.f32 %v647_v9, %v598_v8 }
 0x39d   : > { %v894_v12 = vpop.f32.mrf.mxu1 }
 0x39e   : > { %v660_v13 = vadd.f32 %v658_v57, %v653_v11 }
 0x39f   : > { %v650_v15 = vpop.f32.mrf.mxu1 }
 0x3a0   : > { %v661_v16 = vmax.f32 %v660_v13, 0.0 }
 0x3a1   : > { %v895_v17 = vpop.f32.mrf.mxu1 }
 0x3a2   : > { %v715_v18 = vadd.f32 %v710_v14, %v661_v16 }
 0x3a4   : > { %v716_v19 = vmax.f32 %v715_v18, 0.0 }
 0x3a6   : > { %v717_v20 = vpack.c.bf16 %v716_v19, %v716_v19 }
 0x3a8   : > { %719 = vst.msk [vmem:[%s291_s22] sm:$0xf] %vm718_vm9, %v717_v20 }
 0x3a9   : > { %981 = shalt.err (!%p978_p5)
}
 0x3aa   : > { %s982_s17 = scalar_lea.hbm %s747_s8, 64  ;;  %s986_s20 = scalar_lea.hbm %s1280_s7, 128 }
 0x3ab   : > { %p983_p6 = scmp.ne.s32.totalorder %s747_s8, %s982_s17  ;;  %p987_p10 = scmp.lt.s32.totalorder %s747_s8, %s1280_s7 }
 0x3ac   : > { %p988_p11 = scmp.lt.s32.totalorder %s986_s20, %s982_s17 }
 0x3ad   : > { %p984_p7 = pnand %p983_p6, %p1135_p4 }
 0x3ae   : > { %p989_p12 = por %p988_p11, %p987_p10 }
 0x3af   : > { %p985_p9 = pneg %p984_p7 }
 0x3b1   : > { %p990_p13 = pnand %p989_p12, %p985_p9 }
 0x3b3   : > { %993 = shalt.err (!%p990_p13)
}
 0x3b4   : > { %902 = dma.vmem_to_hbm [thread:$0]  (%p1135_p4), %s750_s23, 64, %s747_s8, %s735_s10  }
 0x3b5 PF: > { %p908_p0 = scmp.ge.s32.totalorder %s1044_s29, 2  ;;  %s761_s21 = sand.u32 1, %s1024_s24  }
 0x3b6   : > { %s762_s12 = scalar_lea.sflag [#allocation5], %s761_s21 }
 0x3b7   : > { %p905_p1 = pnand %p908_p0, %p1142_p8 }
 0x3b9   : > { %p906_p2 = pneg %p905_p1 }
 0x3bb   : > { %1019 = dma.done.wait (%p906_p2), %s762_s12, 64  }
 0x3bc   : > { %1021 = vsyncadd (%p906_p2), %s762_s12, 4294967232  ;;  %s20_s29 = sadd.s32 1, %s1044_s29   ;;  %s1283_s24 = smov %s1028_s25 }
 0x3bd   : > { %p17_p3 = scmp.ge.s32.totalorder %s20_s29, 4   ;;  %s1284_s25 = smov %s1032_s26 }
 0x3be   : > { %s1285_s26 = smov %s1148_s14  ;;  %s1286_s27 = smov %s1040_s28 }
 0x3bf   : > { %s1287_s28 = smov %s1289_s9  ;;  %19 = sbr.rel (!%p17_p3) target bundleno = 4 (0x4), region = 91 }
 0x3c4   :  { %767 = vsyncpa [#allocation5], 1 }
 0x3c5   :  { %769 = vsyncpa [#allocation5 + $0x1], 1 }

</bundles_post_ra>
